<compile_context>
chip_gen: v7x
topology: tpu7x:2x2x1
jax: 0.10.0
libtpu: 0.0.40
codegen_flags: <defaults>
</compile_context>

<pallas_src>
import functools

import jax
import jax.numpy as jnp
import numpy as np
from jax import lax
from jax.experimental import pallas as pl
from jax.experimental.pallas import tpu as pltpu


def _ece_kernel(logits_ref, labels_ref, out_ref,
                cnt_ref, sconf_ref, scorr_ref,
                *, use_logit: bool, inv_temperature: float,
                n_total: int, n_bins: int, tile_n: int):
    pid = pl.program_id(0)

    @pl.when(pid == 0)
    def _init():
        cnt_ref[...] = jnp.zeros_like(cnt_ref)
        sconf_ref[...] = jnp.zeros_like(sconf_ref)
        scorr_ref[...] = jnp.zeros_like(scorr_ref)

    c, t = logits_ref.shape                       # classes on sublanes, batch on lanes
    x = logits_ref[...].astype(jnp.float32)       # (C, T)

    # First-index argmax over classes (sublane axis) on the raw logits.
    # Temperature-scaled softmax is monotone, so this matches argmax(softmax)
    # and torch.max's first-max tie-breaking.
    xmax = jnp.max(x, axis=0, keepdims=True)                          # (1, T)
    row_idx = lax.broadcasted_iota(jnp.int32, (c, t), 0)
    pred = jnp.min(jnp.where(x == xmax, row_idx, c),
                   axis=0, keepdims=True)                             # (1, T) int32

    if use_logit:
        z = x * jnp.float32(inv_temperature)
        zmax = jnp.max(z, axis=0, keepdims=True)                      # (1, T)
        denom = jnp.sum(jnp.exp(z - zmax), axis=0, keepdims=True)     # (1, T)
        # max(softmax) == exp(0) / denom; exact divide keeps bin membership
        # bit-identical to the reference softmax-then-max.
        conf = 1.0 / denom
    else:
        conf = xmax

    correct = (pred == labels_ref[...]).astype(jnp.float32)           # (1, T)

    # Mask out batch-padding columns (N rounded up to the tile size).
    col = pid * tile_n + lax.broadcasted_iota(jnp.int32, (1, t), 1)
    valid = (col < n_total).astype(jnp.float32)                       # (1, T)

    # Per-bin membership; boundaries generated in-kernel: (j/n_bins, (j+1)/n_bins].
    bin_idx = lax.broadcasted_iota(jnp.int32, (n_bins, t), 0).astype(jnp.float32)
    inv_nb = jnp.float32(1.0 / n_bins)
    lowers = bin_idx * inv_nb
    uppers = (bin_idx + 1.0) * inv_nb
    in_bin = jnp.logical_and(conf > lowers, conf <= uppers)
    m = in_bin.astype(jnp.float32) * valid                            # (NB, T)

    cnt_ref[...] += jnp.sum(m, axis=1, keepdims=True)                 # (NB, 1)
    sconf_ref[...] += jnp.sum(m * conf, axis=1, keepdims=True)
    scorr_ref[...] += jnp.sum(m * correct, axis=1, keepdims=True)

    @pl.when(pid == pl.num_programs(0) - 1)
    def _finalize():
        cnt = cnt_ref[...]
        prop = cnt * jnp.float32(1.0 / n_total)
        safe = jnp.maximum(cnt, 1.0)
        gap = jnp.where(cnt > 0.0,
                        jnp.abs(sconf_ref[...] / safe - scorr_ref[...] / safe) * prop,
                        0.0)
        # TODO(synk): the per-bin debug print()s of the PyTorch module are omitted.
        out_ref[...] = jnp.sum(gap, keepdims=True)                    # (1, 1)


def _pick_tile_n(n_rows: int, n_classes: int, itemsize: int) -> int:
    # ~4 MiB of logits per block keeps the double-buffered working set well
    # under the scoped-VMEM default on v5e/v6e and within v7x's smaller
    # 64 MiB physical / 32 MiB scoped budget.
    budget_bytes = 4 * 1024 * 1024
    tile = budget_bytes // max(n_classes * itemsize, 1)
    tile = (tile // 128) * 128
    tile = int(min(max(tile, 128), 4096))
    n_rounded = ((n_rows + 127) // 128) * 128
    return min(tile, n_rounded)


def ece_loss(logits, labels, n_bins: int = 10, LOGIT: bool = True,
             temperature: float = 0.5):
    """JAX/Pallas equivalent of ECELoss.forward. Returns a shape-(1,) f32 array."""
    n, c = logits.shape
    itemsize = jnp.dtype(logits.dtype).itemsize
    tile_n = _pick_tile_n(n, c, itemsize)
    n_pad = ((n + tile_n - 1) // tile_n) * tile_n
    nsteps = n_pad // tile_n

    # Lane-dense layout: batch on lanes, classes on sublanes.  For small C
    # (e.g. 10 classes) this gives ~10x better vreg/VPU utilisation than
    # keeping the class axis on lanes.  Keep the original dtype on the wire;
    # the cast to f32 happens in VMEM/vregs inside the kernel.
    logits_t = jnp.transpose(logits)                                  # (C, N)
    labels_i = labels.astype(jnp.int32)
    if n_pad != n:
        logits_t = jnp.pad(logits_t, ((0, 0), (0, n_pad - n)))
        labels_i = jnp.pad(labels_i, (0, n_pad - n))
    labels2d = labels_i.reshape(1, n_pad)

    kernel = functools.partial(
        _ece_kernel, use_logit=LOGIT, inv_temperature=float(1.0 / temperature),
        n_total=n, n_bins=n_bins, tile_n=tile_n)

    out = pl.pallas_call(
        kernel,
        out_shape=jax.ShapeDtypeStruct((1, 1), jnp.float32),
        grid=(nsteps,),
        in_specs=[
            pl.BlockSpec((c, tile_n), lambda i: (0, i)),
            pl.BlockSpec((1, tile_n), lambda i: (0, i)),
        ],
        out_specs=pl.BlockSpec((1, 1), lambda i: (0, 0)),
        scratch_shapes=[
            pltpu.VMEM((n_bins, 1), jnp.float32),   # bin counts
            pltpu.VMEM((n_bins, 1), jnp.float32),   # bin sum of confidences
            pltpu.VMEM((n_bins, 1), jnp.float32),   # bin sum of correctness
        ],
        compiler_params=pltpu.CompilerParams(
            dimension_semantics=("arbitrary",)),
    )(logits_t, labels2d)
    return out.reshape(1)


def _ece_reference(logits, labels, n_bins=10, temperature=0.5):
    """Pure-JAX reference mirroring the PyTorch module, for verification."""
    sm = jax.nn.softmax(logits.astype(jnp.float32) / temperature, axis=1)
    conf = jnp.max(sm, axis=1)
    pred = jnp.argmax(sm, axis=1)
    correct = (pred == labels).astype(jnp.float32)
    boundaries = jnp.linspace(0.0, 1.0, n_bins + 1, dtype=jnp.float32)
    ece = 0.0
    n = logits.shape[0]
    for i in range(n_bins):
        in_bin = (conf > boundaries[i]) & (conf <= boundaries[i + 1])
        cnt = jnp.sum(in_bin.astype(jnp.float32))
        prop = cnt / n
        avg_conf = jnp.sum(conf * in_bin) / jnp.maximum(cnt, 1.0)
        acc = jnp.sum(correct * in_bin) / jnp.maximum(cnt, 1.0)
        ece = ece + jnp.where(cnt > 0, jnp.abs(avg_conf - acc) * prop, 0.0)
    return jnp.array([ece], dtype=jnp.float32)


if __name__ == "__main__":
    key = jax.random.PRNGKey(0)
    k_logits, k_labels = jax.random.split(key)

    N, C = 16, 10          # batch=16, num_classes=10
    logits = jax.random.normal(k_logits, (N, C), dtype=jnp.float32)
    labels = jax.random.randint(k_labels, (N,), 0, C, dtype=jnp.int32)

    ece = ece_loss(logits, labels, n_bins=10, LOGIT=True)
    jax.block_until_ready(ece)

    ref = _ece_reference(logits, labels, n_bins=10, temperature=0.5)
    assert np.allclose(np.asarray(ece), np.asarray(ref), atol=1e-5), (ece, ref)

    print("KERNEL_OK")
</pallas_src>

<mosaic_0001>
module attributes {stable_mosaic.version = 11 : i64} {
  func.func @_ece_kernel(%arg0: i32, %arg1: memref<10x128xf32, #tpu.memory_space<vmem>>, %arg2: memref<1x128xi32, #tpu.memory_space<vmem>>, %arg3: memref<1x1xf32, #tpu.memory_space<vmem>>, %arg4: memref<10x1xf32, #tpu.memory_space<vmem>>, %arg5: memref<10x1xf32, #tpu.memory_space<vmem>>, %arg6: memref<10x1xf32, #tpu.memory_space<vmem>>) attributes {dimension_semantics = [#tpu.dimension_semantics<arbitrary>], iteration_bounds = array<i64: 1>, scalar_prefetch = 0 : i64, scratch_operands = 3 : i64, tpu.core_type = #tpu.core_type<tc>, window_params = [{transform_indices = @transform_0, window_bounds = array<i64: 10, 128>}, {transform_indices = @transform_1, window_bounds = array<i64: 1, 128>}, {pipeline_mode = #tpu.pipeline_mode<synchronous>, transform_indices = @transform_2, window_bounds = array<i64: 1, 1>}]} {
    %c0_i32 = arith.constant 0 : i32
    %0 = arith.cmpi eq, %arg0, %c0_i32 : i32
    %1 = arith.extui %0 : i1 to i32
    %c0_i32_0 = arith.constant 0 : i32
    %2 = arith.cmpi ne, %1, %c0_i32_0 : i32
    scf.if %2 {
      %cst_29 = arith.constant 0.000000e+00 : f32
      %75 = vector.broadcast %cst_29 : f32 to vector<10x1xf32>
      %c0_30 = arith.constant 0 : index
      %c0_31 = arith.constant 0 : index
      %76 = vector.load %arg4[%c0_30, %c0_31] : memref<10x1xf32, #tpu.memory_space<vmem>>, vector<10x1xf32>
      tpu.vector_store %arg4[%c0_30, %c0_31], %75 {strides = array<i32>} : memref<10x1xf32, #tpu.memory_space<vmem>>, vector<10x1xf32>,
      %cst_32 = arith.constant 0.000000e+00 : f32
      %77 = vector.broadcast %cst_32 : f32 to vector<10x1xf32>
      %c0_33 = arith.constant 0 : index
      %c0_34 = arith.constant 0 : index
      %78 = vector.load %arg5[%c0_33, %c0_34] : memref<10x1xf32, #tpu.memory_space<vmem>>, vector<10x1xf32>
      tpu.vector_store %arg5[%c0_33, %c0_34], %77 {strides = array<i32>} : memref<10x1xf32, #tpu.memory_space<vmem>>, vector<10x1xf32>,
      %cst_35 = arith.constant 0.000000e+00 : f32
      %79 = vector.broadcast %cst_35 : f32 to vector<10x1xf32>
      %c0_36 = arith.constant 0 : index
      %c0_37 = arith.constant 0 : index
      %80 = vector.load %arg6[%c0_36, %c0_37] : memref<10x1xf32, #tpu.memory_space<vmem>>, vector<10x1xf32>
      tpu.vector_store %arg6[%c0_36, %c0_37], %79 {strides = array<i32>} : memref<10x1xf32, #tpu.memory_space<vmem>>, vector<10x1xf32>,
    } else {
    }
    %c0 = arith.constant 0 : index
    %c0_1 = arith.constant 0 : index
    %3 = vector.load %arg1[%c0, %c0_1] : memref<10x128xf32, #tpu.memory_space<vmem>>, vector<10x128xf32>
    %cst = arith.constant dense<0xFF800000> : vector<128xf32>
    %4 = vector.multi_reduction <maximumf>, %3, %cst [0] : vector<10x128xf32> to vector<128xf32>
    %5 = vector.shape_cast %4 : vector<128xf32> to vector<1x128xf32>
    %6 = tpu.iota {dimensions = array<i32: 0>} : vector<10x128xi32>
    %7 = vector.broadcast %5 : vector<1x128xf32> to vector<10x128xf32>
    %8 = arith.cmpf oeq, %3, %7 : vector<10x128xf32>
    %c10_i32 = arith.constant 10 : i32
    %9 = vector.broadcast %c10_i32 : i32 to vector<10x128xi32>
    %10 = arith.select %8, %6, %9 : vector<10x128xi1>, vector<10x128xi32>
    %cst_2 = arith.constant dense<2147483647> : vector<128xi32>
    %11 = vector.multi_reduction <minsi>, %10, %cst_2 [0] : vector<10x128xi32> to vector<128xi32>
    %12 = vector.shape_cast %11 : vector<128xi32> to vector<1x128xi32>
    %cst_3 = arith.constant 2.000000e+00 : f32
    %13 = vector.broadcast %cst_3 : f32 to vector<10x128xf32>
    %14 = arith.mulf %3, %13 : vector<10x128xf32>
    %cst_4 = arith.constant dense<0xFF800000> : vector<128xf32>
    %15 = vector.multi_reduction <maximumf>, %14, %cst_4 [0] : vector<10x128xf32> to vector<128xf32>
    %16 = vector.shape_cast %15 : vector<128xf32> to vector<1x128xf32>
    %17 = vector.broadcast %16 : vector<1x128xf32> to vector<10x128xf32>
    %18 = arith.subf %14, %17 : vector<10x128xf32>
    %19 = math.exp %18 : vector<10x128xf32>
    %cst_5 = arith.constant dense<0.000000e+00> : vector<128xf32>
    %20 = vector.multi_reduction <add>, %19, %cst_5 [0] : vector<10x128xf32> to vector<128xf32>
    %21 = vector.shape_cast %20 : vector<128xf32> to vector<1x128xf32>
    %cst_6 = arith.constant 1.000000e+00 : f32
    %22 = vector.broadcast %cst_6 : f32 to vector<1x128xf32>
    %23 = arith.divf %22, %21 : vector<1x128xf32>
    %c0_7 = arith.constant 0 : index
    %c0_8 = arith.constant 0 : index
    %24 = vector.load %arg2[%c0_7, %c0_8] : memref<1x128xi32, #tpu.memory_space<vmem>>, vector<1x128xi32>
    %25 = arith.cmpi eq, %12, %24 : vector<1x128xi32>
    %26 = arith.extui %25 : vector<1x128xi1> to vector<1x128xi32>
    %27 = arith.sitofp %26 : vector<1x128xi32> to vector<1x128xf32>
    %c128_i32 = arith.constant 128 : i32
    %28 = arith.muli %arg0, %c128_i32 : i32
    %29 = tpu.iota {dimensions = array<i32: 1>} : vector<1x128xi32>
    %30 = vector.broadcast %28 : i32 to vector<1x128xi32>
    %31 = arith.addi %30, %29 : vector<1x128xi32>
    %c16_i32 = arith.constant 16 : i32
    %32 = vector.broadcast %c16_i32 : i32 to vector<1x128xi32>
    %33 = arith.cmpi slt, %31, %32 : vector<1x128xi32>
    %34 = arith.extui %33 : vector<1x128xi1> to vector<1x128xi32>
    %35 = arith.sitofp %34 : vector<1x128xi32> to vector<1x128xf32>
    %36 = tpu.iota {dimensions = array<i32: 0>} : vector<10x128xi32>
    %37 = arith.sitofp %36 : vector<10x128xi32> to vector<10x128xf32>
    %cst_9 = arith.constant 1.000000e-01 : f32
    %38 = vector.broadcast %cst_9 : f32 to vector<10x128xf32>
    %39 = arith.mulf %37, %38 : vector<10x128xf32>
    %cst_10 = arith.constant 1.000000e+00 : f32
    %40 = vector.broadcast %cst_10 : f32 to vector<10x128xf32>
    %41 = arith.addf %37, %40 : vector<10x128xf32>
    %cst_11 = arith.constant 1.000000e-01 : f32
    %42 = vector.broadcast %cst_11 : f32 to vector<10x128xf32>
    %43 = arith.mulf %41, %42 : vector<10x128xf32>
    %44 = vector.broadcast %23 : vector<1x128xf32> to vector<10x128xf32>
    %45 = arith.cmpf ogt, %44, %39 : vector<10x128xf32>
    %46 = vector.broadcast %23 : vector<1x128xf32> to vector<10x128xf32>
    %47 = arith.cmpf ole, %46, %43 : vector<10x128xf32>
    %48 = arith.andi %45, %47 : vector<10x128xi1>
    %49 = arith.extui %48 : vector<10x128xi1> to vector<10x128xi32>
    %50 = arith.sitofp %49 : vector<10x128xi32> to vector<10x128xf32>
    %51 = vector.broadcast %35 : vector<1x128xf32> to vector<10x128xf32>
    %52 = arith.mulf %50, %51 : vector<10x128xf32>
    %c0_12 = arith.constant 0 : index
    %c0_13 = arith.constant 0 : index
    %53 = vector.load %arg4[%c0_12, %c0_13] : memref<10x1xf32, #tpu.memory_space<vmem>>, vector<10x1xf32>
    %cst_14 = arith.constant dense<0.000000e+00> : vector<10xf32>
    %54 = vector.multi_reduction <add>, %52, %cst_14 [1] : vector<10x128xf32> to vector<10xf32>
    %55 = vector.shape_cast %54 : vector<10xf32> to vector<10x1xf32>
    %56 = arith.addf %53, %55 : vector<10x1xf32>
    %c0_15 = arith.constant 0 : index
    %c0_16 = arith.constant 0 : index
    %57 = vector.load %arg4[%c0_15, %c0_16] : memref<10x1xf32, #tpu.memory_space<vmem>>, vector<10x1xf32>
    tpu.vector_store %arg4[%c0_15, %c0_16], %56 {strides = array<i32>} : memref<10x1xf32, #tpu.memory_space<vmem>>, vector<10x1xf32>,
    %c0_17 = arith.constant 0 : index
    %c0_18 = arith.constant 0 : index
    %58 = vector.load %arg5[%c0_17, %c0_18] : memref<10x1xf32, #tpu.memory_space<vmem>>, vector<10x1xf32>
    %59 = vector.broadcast %23 : vector<1x128xf32> to vector<10x128xf32>
    %60 = arith.mulf %52, %59 : vector<10x128xf32>
    %cst_19 = arith.constant dense<0.000000e+00> : vector<10xf32>
    %61 = vector.multi_reduction <add>, %60, %cst_19 [1] : vector<10x128xf32> to vector<10xf32>
    %62 = vector.shape_cast %61 : vector<10xf32> to vector<10x1xf32>
    %63 = arith.addf %58, %62 : vector<10x1xf32>
    %c0_20 = arith.constant 0 : index
    %c0_21 = arith.constant 0 : index
    %64 = vector.load %arg5[%c0_20, %c0_21] : memref<10x1xf32, #tpu.memory_space<vmem>>, vector<10x1xf32>
    tpu.vector_store %arg5[%c0_20, %c0_21], %63 {strides = array<i32>} : memref<10x1xf32, #tpu.memory_space<vmem>>, vector<10x1xf32>,
    %c0_22 = arith.constant 0 : index
    %c0_23 = arith.constant 0 : index
    %65 = vector.load %arg6[%c0_22, %c0_23] : memref<10x1xf32, #tpu.memory_space<vmem>>, vector<10x1xf32>
    %66 = vector.broadcast %27 : vector<1x128xf32> to vector<10x128xf32>
    %67 = arith.mulf %52, %66 : vector<10x128xf32>
    %cst_24 = arith.constant dense<0.000000e+00> : vector<10xf32>
    %68 = vector.multi_reduction <add>, %67, %cst_24 [1] : vector<10x128xf32> to vector<10xf32>
    %69 = vector.shape_cast %68 : vector<10xf32> to vector<10x1xf32>
    %70 = arith.addf %65, %69 : vector<10x1xf32>
    %c0_25 = arith.constant 0 : index
    %c0_26 = arith.constant 0 : index
    %71 = vector.load %arg6[%c0_25, %c0_26] : memref<10x1xf32, #tpu.memory_space<vmem>>, vector<10x1xf32>
    tpu.vector_store %arg6[%c0_25, %c0_26], %70 {strides = array<i32>} : memref<10x1xf32, #tpu.memory_space<vmem>>, vector<10x1xf32>,
    %c0_i32_27 = arith.constant 0 : i32
    %72 = arith.cmpi eq, %arg0, %c0_i32_27 : i32
    %73 = arith.extui %72 : i1 to i32
    %c0_i32_28 = arith.constant 0 : i32
    %74 = arith.cmpi ne, %73, %c0_i32_28 : i32
    scf.if %74 {
      %c0_29 = arith.constant 0 : index
      %c0_30 = arith.constant 0 : index
      %75 = vector.load %arg4[%c0_29, %c0_30] : memref<10x1xf32, #tpu.memory_space<vmem>>, vector<10x1xf32>
      %cst_31 = arith.constant 6.250000e-02 : f32
      %76 = vector.broadcast %cst_31 : f32 to vector<10x1xf32>
      %77 = arith.mulf %75, %76 : vector<10x1xf32>
      %cst_32 = arith.constant 1.000000e+00 : f32
      %78 = vector.broadcast %cst_32 : f32 to vector<10x1xf32>
      %79 = arith.maximumf %75, %78 : vector<10x1xf32>
      %cst_33 = arith.constant 0.000000e+00 : f32
      %80 = vector.broadcast %cst_33 : f32 to vector<10x1xf32>
      %81 = arith.cmpf ogt, %75, %80 : vector<10x1xf32>
      %c0_34 = arith.constant 0 : index
      %c0_35 = arith.constant 0 : index
      %82 = vector.load %arg5[%c0_34, %c0_35] : memref<10x1xf32, #tpu.memory_space<vmem>>, vector<10x1xf32>
      %83 = arith.divf %82, %79 : vector<10x1xf32>
      %c0_36 = arith.constant 0 : index
      %c0_37 = arith.constant 0 : index
      %84 = vector.load %arg6[%c0_36, %c0_37] : memref<10x1xf32, #tpu.memory_space<vmem>>, vector<10x1xf32>
      %85 = arith.divf %84, %79 : vector<10x1xf32>
      %86 = arith.subf %83, %85 : vector<10x1xf32>
      %87 = math.absf %86 : vector<10x1xf32>
      %88 = arith.mulf %87, %77 : vector<10x1xf32>
      %cst_38 = arith.constant 0.000000e+00 : f32
      %89 = vector.broadcast %cst_38 : f32 to vector<10x1xf32>
      %90 = arith.select %81, %88, %89 : vector<10x1xi1>, vector<10x1xf32>
      %91 = vector.shape_cast %90 : vector<10x1xf32> to vector<1x10x1xf32>
      %cst_39 = arith.constant dense<0.000000e+00> : vector<1xf32>
      %92 = vector.multi_reduction <add>, %91, %cst_39 [1, 2] : vector<1x10x1xf32> to vector<1xf32>
      %93 = vector.shape_cast %92 : vector<1xf32> to vector<1x1x1xf32>
      %94 = vector.extract %93[0, 0, 0] : f32 from vector<1x1x1xf32>
      %95 = vector.broadcast %94 : f32 to vector<1x1xf32>
      %c0_40 = arith.constant 0 : index
      %c0_41 = arith.constant 0 : index
      %96 = vector.load %arg3[%c0_40, %c0_41] : memref<1x1xf32, #tpu.memory_space<vmem>>, vector<1x1xf32>
      tpu.vector_store %arg3[%c0_40, %c0_41], %95 {strides = array<i32>} : memref<1x1xf32, #tpu.memory_space<vmem>>, vector<1x1xf32>,
    } else {
    }
    return
  }
  func.func @transform_0(%arg0: i32) -> (i32, i32) {
    %c0_i32 = arith.constant 0 : i32
    %c0_i32_0 = arith.constant 0 : i32
    return %c0_i32, %arg0 : i32, i32
  }
  func.func @transform_1(%arg0: i32) -> (i32, i32) {
    %c0_i32 = arith.constant 0 : i32
    %c0_i32_0 = arith.constant 0 : i32
    return %c0_i32, %arg0 : i32, i32
  }
  func.func @transform_2(%arg0: i32) -> (i32, i32) {
    %c0_i32 = arith.constant 0 : i32
    %c0_i32_0 = arith.constant 0 : i32
    %c0_i32_1 = arith.constant 0 : i32
    return %c0_i32, %c0_i32_0 : i32, i32
  }
}

</mosaic_0001>

<bundles_post_ra>
// kernel: tpu_custom_call.1
= control target key start
LH: loop header
LB: loop body
LE: loop exit
PB: predicated region body
PF: predicated region fallthrough
CT: control target
= control target key end

     0   :  { %7 = vsyncpa [#allocation6], 0  ;;  %s381_s0 = inlined_call_operand.hbm [shape: f32[10,128], index: 0, kind: input, shape index: {}]   ;;  %s382_s1 = inlined_call_operand.vmem [shape: s32[1,128], index: 1, kind: input, shape index: {}]   ;;  %s383_s2 = inlined_call_operand.hbm [shape: f32[1,1], index: 2, kind: output, shape index: {}]  }
   0x1   :  { %8 = vsyncpa [#allocation7], 0  ;;  %s297_s9 = smov [#allocation5]   ;;  %s249_s13 = scalar_lea.hbm %s381_s0, 256 }
   0x2   :  { %s14_s10 = sshll.u32 %s297_s9, 4  ;;  %p250_p0 = scmp.ne.s32.totalorder %s381_s0, %s249_s13  ;;  %s15_s10 = int_to_ptr.vmem [resolvable:$true] %s14_s10 }
   0x3   :  { %p253_p1 = scmp.lt.u32.totalorder %s249_s13, %s381_s0 }
   0x5   :  { %p255_p2 = pnand %p253_p1, %p250_p0 }
   0x7   :  { %258 = shalt.err (!%p255_p2)
}
   0x8   :  { %s259_s18 = scalar_lea.vmem %s15_s10, 256  ;;  %p264_p4 = scmp.lt.s32.totalorder %s15_s10, %s15_s10 }
   0x9   :  { %p260_p3 = scmp.ne.s32.totalorder %s15_s10, %s259_s18  ;;  %p265_p5 = scmp.lt.s32.totalorder %s259_s18, %s259_s18 }
   0xb   :  { %p266_p6 = por %p265_p5, %p264_p4 }
   0xd   :  { %p267_p7 = pnand %p266_p6, %p260_p3 }
   0xf   :  { %270 = shalt.err (!%p267_p7)
}
  0x10   :  { %s298_s19 = smov 128   ;;  %s299_s20 = smov 8  }
  0x11   :  { %20 = dma.hbm_to_vmem [thread:$0]  %s381_s0, 256, %s15_s10, [#allocation6], %s298_s19, %s298_s19, %s299_s20  }
  0x12   :  { %293 = dma.done.wait [#allocation6], 256  }
  0x13   :  { %294 = vsyncadd [#allocation6], 4294967040  ;;  %vm30_vm0 = vcmask 7168   ;;  %v300_v0 = vmov 0.0   ;;  %v38_v1 = vld [vmem:[#allocation5] sm:$0xff]  ;;  %vm40_vm1 = vcmask 1041408   ;;  %v49_v10 = vlaneseq }
  0x14   :  { %31 = vst.msk [vmem:[#allocation2] sm:$0xff] %vm30_vm0, %v300_v0  ;;  %34 = vst.msk [vmem:[#allocation3] sm:$0xff] %vm30_vm0, %v300_v0  ;;  %v39_v2 = vld [vmem:[#allocation5 + $0x8] sm:$0x3]  ;;  %v68_v3 = vmul.f32 2.0, %v38_v1 }
  0x15   :  { %36 = vst.msk [vmem:[#allocation4] sm:$0xff] %vm30_vm0, %v300_v0  ;;  %v69_v4 = vmul.f32 2.0, %v39_v2  ;;  %v41_v5 = vsel %vm40_vm1, %v39_v2, -inf  ;;  %v337_v15 = vshrl.u32 %v49_v10, 7  ;;  %v100_v49 = vand.u32 127, %v49_v10 }
  0x16   :  { %v42_v6 = vmax.f32 %v38_v1, %v41_v5  ;;  %v94_v53 = vld [vmem:[%s382_s1] sm:$0x1]  ;;  %s301_s1 = smov [#allocation8]  }
  0x17   :  { %v70_v7 = vsel %vm40_vm1, %v69_v4, -inf  ;;  %v51_v20 = vadd.s32 8, %v337_v15  ;;  %v106_v46 = vcvt.s32.f32 %v337_v15  ;;  %vm103_vm8 = vcmp.lt.s32.totalorder %v100_v49, 16  ;;  %s219_s24 = sshll.u32 %s301_s1, 4  ;;  %s220_s24 = int_to_ptr.vmem [resolvable:$true] %s219_s24 }
  0x18   :  { %v71_v8 = vmax.f32 %v68_v3, %v70_v7  ;;  %v43_v9 = vrot.slane %v42_v6, 4  ;;  %v229_v59 = vsel %vm103_vm8, 1.0, %v300_v0  ;;  %v156_v60 = vsub.s32 0, %v337_v15  ;;  %s271_s26 = scalar_lea.vmem %s220_s24, 16  ;;  %s275_s27 = scalar_lea.vmem %s220_s24, 32 }
  0x19   :  { %v107_v47 = vcvt.s32.f32 %v51_v20  ;;  %v110_v50 = vadd.f32 1.0, %v106_v46  ;;  %v108_v52 = vmul.f32 0.1, %v106_v46  ;;  %p272_p8 = scmp.ne.s32.totalorder %s220_s24, %s271_s26  ;;  %p276_p9 = scmp.lt.s32.totalorder %s220_s24, %s220_s24 }
  0x1a   :  { %v72_v11 = vrot.slane %v71_v8, 4  ;;  %v44_v12 = vmax.f32 %v42_v6, %v43_v9  ;;  %p277_p10 = scmp.lt.s32.totalorder %s275_s27, %s271_s26 }
  0x1b   :  { %v111_v51 = vadd.f32 1.0, %v107_v47  ;;  %v112_v54 = vmul.f32 0.1, %v110_v50  ;;  %v109_v55 = vmul.f32 0.1, %v107_v47 }
  0x1c   :  { %v73_v13 = vmax.f32 %v71_v8, %v72_v11  ;;  %v45_v14 = vrot.slane %v44_v12, 2  ;;  %v126_v11 = vld [vmem:[#allocation2] sm:$0xff]  ;;  %p278_p11 = por %p277_p10, %p276_p9 }
  0x1d   :  { %v113_v56 = vmul.f32 0.1, %v111_v51 }
  0x1e   :  { %v74_v16 = vrot.slane %v73_v13, 2  ;;  %v46_v17 = vmax.f32 %v44_v12, %v45_v14  ;;  %p279_p12 = pnand %p278_p11, %p272_p8 }
  0x20   :  { %v75_v18 = vmax.f32 %v73_v13, %v74_v16  ;;  %v47_v19 = vrot.slane %v46_v17, 1  ;;  %v139_v13 = vld [vmem:[#allocation3] sm:$0xff] }
  0x22   :  { %v76_v21 = vrot.slane %v75_v18, 1  ;;  %v48_v22 = vmax.f32 %v46_v17, %v47_v19 }
  0x24   :  { %v77_v23 = vmax.f32 %v75_v18, %v76_v21  ;;  %vm53_vm2 = vcmp.eq.f32.partialorder %v39_v2, %v48_v22  ;;  %vm52_vm3 = vcmp.eq.f32.partialorder %v38_v1, %v48_v22  ;;  %v152_v22 = vld [vmem:[#allocation4] sm:$0xff] }
  0x25   :  { %v55_v24 = vsel %vm53_vm2, %v51_v20, 10  ;;  %v54_v27 = vsel %vm52_vm3, %v337_v15, 10  ;;  %vm32_vm2 = vcmask 1024  }
  0x26   :  { %v78_v25 = vsub.f32 %v68_v3, %v77_v23  ;;  %v79_v26 = vsub.f32 %v69_v4, %v77_v23  ;;  %v56_v30 = vsel %vm40_vm1, %v55_v24, 2147483647  ;;  %33 = vst.msk [vmem:[#allocation2 + $0x8] sm:$0x3] %vm32_vm2, %v300_v0  ;;  %35 = vst.msk [vmem:[#allocation3 + $0x8] sm:$0x3] %vm32_vm2, %v300_v0 }
  0x27   :  { %vm57_vm4 = vcmp.lt.s32.totalorder %v54_v27, %v56_v30  ;;  %37 = vst.msk [vmem:[#allocation4 + $0x8] sm:$0x3] %vm32_vm2, %v300_v0 }
  0x28   :  { %v80_v28 = vmul.f32 1.442695, %v78_v25  ;;  %v82_v29 = vmul.f32 1.442695, %v79_v26  ;;  %v58_v31 = vsel %vm57_vm4, %v54_v27, %v56_v30  ;;  %vm211_vm4 = vcmask 0  }
  0x29   :  { %v59_v32 = vrot.slane %v58_v31, 4 }
  0x2a   :  { %239 = vpow2.f32 %v80_v28 }
  0x2b   :  { %241 = vpow2.f32 %v82_v29  ;;  %vm60_vm5 = vcmp.lt.s32.totalorder %v58_v31, %v59_v32 }
  0x2c   :  { %v61_v37 = vsel %vm60_vm5, %v58_v31, %v59_v32 }
  0x2d   :  { %v62_v40 = vrot.slane %v61_v37, 2  ;;  %v127_v15 = vld [vmem:[#allocation2 + $0x8] sm:$0x3]  ;;  %v140_v19 = vld [vmem:[#allocation3 + $0x8] sm:$0x3] }
  0x2e   :  { %v153_v24 = vld [vmem:[#allocation4 + $0x8] sm:$0x3] }
  0x2f   :  { %vm63_vm6 = vcmp.lt.s32.totalorder %v61_v37, %v62_v40 }
  0x30   :  { %v64_v44 = vsel %vm63_vm6, %v61_v37, %v62_v40 }
  0x31   :  { %v65_v48 = vrot.slane %v64_v44, 1 }
  0x33   :  { %vm66_vm7 = vcmp.lt.s32.totalorder %v64_v44, %v65_v48 }
  0x34   :  { %v240_v33 = vpop.eup %239  ;;  %v67_v57 = vsel %vm66_vm7, %v64_v44, %v65_v48 }
  0x35   :  { %v242_v34 = vpop.eup %241  ;;  %vm95_vm9 = vcmp.eq.s32.totalorder %v67_v57, %v94_v53 }
  0x36   :  { %v84_v35 = vsel %vm40_vm1, %v242_v34, 0.0  ;;  %v228_v62 = vsel %vm95_vm9, 1.0, %v300_v0 }
  0x37   :  { %v85_v36 = vadd.f32 %v240_v33, %v84_v35  ;;  %v157_v4 = vrot.slane %v228_v62, %v156_v60 }
  0x39   :  { %v86_v38 = vrot.slane %v85_v36, 4 }
  0x3b   :  { %v87_v39 = vadd.f32 %v86_v38, %v85_v36 }
  0x3d   :  { %v88_v41 = vrot.slane %v87_v39, 2 }
  0x3f   :  { %v89_v42 = vadd.f32 %v88_v41, %v87_v39 }
  0x41   :  { %v90_v43 = vrot.slane %v89_v42, 1 }
  0x43   :  { %v91_v45 = vadd.f32 %v90_v43, %v89_v42 }
  0x45   :  { %243 = vrcp.f32 %v91_v45 }
  0x4f   :  { %v244_v58 = vpop.eup %243 }
  0x50   :  { %vm114_vm10 = vcmp.gt.f32.partialorder %v244_v58, %v108_v52  ;;  %vm116_vm11 = vcmp.le.f32.partialorder %v244_v58, %v112_v54  ;;  %vm115_vm12 = vcmp.gt.f32.partialorder %v244_v58, %v109_v55  ;;  %vm117_vm13 = vcmp.le.f32.partialorder %v244_v58, %v113_v56 }
  0x51   :  { %vm118_vm14 = vmand %vm114_vm10, %vm116_vm11 }
  0x52   :  { %v230_v61 = vsel %vm118_vm14, 1.0, %v300_v0  ;;  %vm119_vm15 = vmand %vm115_vm12, %vm117_vm13 }
  0x53   :  { %v124_v63 = vmul.f32 %v230_v61, %v229_v59  ;;  %v231_v1 = vsel %vm119_vm15, 1.0, %v300_v0 }
  0x54   :  { %v125_v2 = vmul.f32 %v231_v1, %v229_v59 }
  0x55   :  { %128 = vadd.xlane.f32.xlu0 %v124_v63  ;;  %v141_v3 = vmul.f32 %v244_v58, %v124_v63  ;;  %v158_v9 = vmul.f32 %v157_v4, %v124_v63 }
  0x56   :  { %v130_v5 = vsel %vm40_vm1, %v125_v2, 0.0  ;;  %v142_v6 = vmul.f32 %v244_v58, %v125_v2  ;;  %v159_v8 = vmul.f32 %v157_v4, %v125_v2 }
  0x57   :  { %143 = vadd.xlane.f32.xlu1 %v141_v3 }
  0x58   :  { %v145_v7 = vsel %vm40_vm1, %v142_v6, 0.0  ;;  %v162_v10 = vsel %vm40_vm1, %v159_v8, 0.0 }
  0x59   :  { %131 = vadd.xlane.f32.xlu0 %v130_v5 }
  0x5b   :  { %146 = vadd.xlane.f32.xlu1 %v145_v7 }
  0x5d   :  { %160 = vadd.xlane.f32.xlu0 %v158_v9 }
  0x5f   :  { %163 = vadd.xlane.f32.xlu1 %v162_v10 }
  0xe2   :  { %v129_v12 = vpop.xlane.xlu0 %128 }
  0xe3   :  { %v133_v14 = vadd.f32 %v129_v12, %v126_v11 }
  0xe4   :  { %v144_v16 = vpop.xlane.xlu1 %143 }
  0xe5   :  { %136 = vst.msk [vmem:[#allocation2] sm:$0xff] %vm30_vm0, %v133_v14  ;;  %v148_v17 = vadd.f32 %v144_v16, %v139_v13 }
  0xe6   :  { %v132_v18 = vpop.xlane.xlu0 %131 }
  0xe7   :  { %v134_v20 = vadd.f32 %v132_v18, %v127_v15  ;;  %150 = vst.msk [vmem:[#allocation3] sm:$0xff] %vm30_vm0, %v148_v17 }
  0xe8   :  { %v147_v21 = vpop.xlane.xlu1 %146 }
  0xe9   :  { %138 = vst.msk [vmem:[#allocation2 + $0x8] sm:$0x3] %vm32_vm2, %v134_v20  ;;  %v149_v23 = vadd.f32 %v147_v21, %v140_v19 }
  0xea   :  { %v161_v0 = vpop.xlane.xlu0 %160 }
  0xeb   :  { %151 = vst.msk [vmem:[#allocation3 + $0x8] sm:$0x3] %vm32_vm2, %v149_v23  ;;  %v165_v25 = vadd.f32 %v161_v0, %v152_v22 }
  0xec   :  { %v164_v26 = vpop.xlane.xlu1 %163  ;;  %v172_v27 = vld [vmem:[#allocation2] sm:$0xff] }
  0xed   :  { %167 = vst.msk [vmem:[#allocation4] sm:$0xff] %vm30_vm0, %v165_v25  ;;  %v166_v28 = vadd.f32 %v164_v26, %v153_v24  ;;  %v176_v29 = vmax.f32 %v172_v27, 1.0  ;;  %v174_v41 = vmul.f32 0.0625, %v172_v27  ;;  %vm178_vm1 = vcmp.gt.f32.partialorder %v172_v27, 0.0 }
  0xee   :  { %v180_v34 = vld [vmem:[#allocation3] sm:$0xff] }
  0xef   :  { %168 = vst.msk [vmem:[#allocation4 + $0x8] sm:$0x3] %vm32_vm2, %v166_v28  ;;  %245 = vrcp.f32 %v176_v29 }
  0xf0   :  { %v173_v30 = vld [vmem:[#allocation2 + $0x8] sm:$0x3] }
  0xf1   :  { %v177_v31 = vmax.f32 %v173_v30, 1.0  ;;  %v175_v47 = vmul.f32 0.0625, %v173_v30  ;;  %vm179_vm3 = vcmp.gt.f32.partialorder %v173_v30, 0.0 }
  0xf2   :  { %v181_v40 = vld [vmem:[#allocation3 + $0x8] sm:$0x3] }
  0xf3   :  { %247 = vrcp.f32 %v177_v31 }
  0xf4   :  { %v186_v32 = vld [vmem:[#allocation4] sm:$0xff] }
  0xf6   :  { %v187_v37 = vld [vmem:[#allocation4 + $0x8] sm:$0x3] }
  0xf9   :  { %v246_v33 = vpop.eup %245 }
  0xfa   :  { %v183_v35 = vmul.f32 %v246_v33, %v180_v34  ;;  %v188_v36 = vmul.f32 %v246_v33, %v186_v32 }
  0xfc   :  { %v190_v38 = vsub.f32 %v183_v35, %v188_v36 }
  0xfd   :  { %v248_v39 = vpop.eup %247 }
  0xfe   :  { %v185_v42 = vmul.f32 %v248_v39, %v181_v40  ;;  %v189_v43 = vmul.f32 %v248_v39, %v187_v37  ;;  %v192_v44 = vand.u32 2147483647, %v190_v38 }
 0x100   :  { %v191_v45 = vsub.f32 %v185_v42, %v189_v43  ;;  %v194_v46 = vmul.f32 %v192_v44, %v174_v41 }
 0x102   :  { %v193_v48 = vand.u32 2147483647, %v191_v45  ;;  %v196_v50 = vsel %vm178_vm1, %v194_v46, 0.0 }
 0x103   :  { %v198_v52 = vsel %vm30_vm0, %v196_v50, 0.0 }
 0x104   :  { %v195_v49 = vmul.f32 %v193_v48, %v175_v47 }
 0x106   :  { %v197_v51 = vsel %vm179_vm3, %v195_v49, 0.0 }
 0x107   :  { %v199_v53 = vsel %vm32_vm2, %v197_v51, 0.0 }
 0x108   :  { %v200_v54 = vadd.f32 %v199_v53, %v198_v52 }
 0x10a   :  { %201 = vadd.xlane.f32.xlu0 %v200_v54 }
 0x197   :  { %v202_v55 = vpop.xlane.xlu0 %201 }
 0x198   :  { %v203_v56 = vrot.slane %v202_v55, 4 }
 0x19a   :  { %v204_v57 = vadd.f32 %v203_v56, %v202_v55 }
 0x19c   :  { %v205_v58 = vrot.slane %v204_v57, 2 }
 0x19e   :  { %v206_v59 = vadd.f32 %v205_v58, %v204_v57 }
 0x1a0   :  { %v207_v60 = vrot.slane %v206_v59, 1 }
 0x1a2   :  { %v208_v61 = vadd.f32 %v207_v60, %v206_v59 }
 0x1a4   :  { %232 = vpush %v208_v61 }
 0x1d5   :  { %s233_s25 = spop %232 }
 0x1d6   :  { %v210_v62 = vstv %s233_s25 }
 0x1d7   :  { %212 = vst.msk [vmem:[#allocation8] sm:$0x1] %vm211_vm4, %v210_v62 }
 0x1d8   :  { %282 = shalt.err (!%p279_p12)
}
 0x1d9   :  { %s283_s30 = scalar_lea.hbm %s383_s2, 16 }
 0x1da   :  { %p284_p13 = scmp.ne.s32.totalorder %s383_s2, %s283_s30  ;;  %p287_p0 = scmp.lt.u32.totalorder %s283_s30, %s383_s2 }
 0x1dc   :  { %p289_p1 = pnand %p287_p0, %p284_p13 }
 0x1de   :  { %292 = shalt.err (!%p289_p1)
}
 0x1df   :  { %222 = dma.vmem_to_hbm [thread:$0]  %s220_s24, 16, %s383_s2, [#allocation7]  }
 0x1e0   :  { %295 = dma.done.wait [#allocation7], 16  }
 0x1e1   :  { %296 = vsyncadd [#allocation7], 4294967280 }
 0x1e2   :  { %226 = vsyncpa [#allocation6], 1 }
 0x1e3   :  { %227 = vsyncpa [#allocation7], 1 }

</bundles_post_ra>
